<compile_context>
chip_gen: v7x
topology: tpu7x:2x2x1
jax: 0.10.0
libtpu: 0.0.40
codegen_flags: <defaults>
</compile_context>

<pallas_src>
import jax
import jax.numpy as jnp
from jax.experimental import pallas as pl
from jax.experimental.pallas import tpu as pltpu


def _round_up(n, m):
    return (n + m - 1) // m * m


def _choose_k_tile(K):
    # Block last dim must be a multiple of 128 or the full extent.
    if K % 128 != 0:
        return K
    for tk in (1024, 512, 256, 128):
        if K % tk == 0:
            return tk
    return K


# --------------------------------------------------------------------------
# Kernel 1: fused per-(batch, K-tile) hot path, channel-major layout.
#   y       = Wbig @ x_tile + bbig          (one MXU pass; rows = all 3 heads)
#   xl_conv = y[:NC]                        (conv2 output, conv memory layout)
#   h       = tanh(y[tanh rows]) * sigmoid(y[sigm rows])
#   w_row   = sigmoid(w3_row @ h + b3)      (lane-dense attention weights)
# --------------------------------------------------------------------------
def _make_bagnet_kernel(nc, att, ncp, attp):
    def kernel(x_ref, wbig_ref, bbig_ref, w3_ref, b3_ref, xl_ref, xw_ref):
        x = x_ref[0]                                   # (C, TK) channel-major
        y = jnp.dot(wbig_ref[...], x,
                    preferred_element_type=jnp.float32) + bbig_ref[...]
        xl_ref[0] = y[:nc, :]                          # (NC, TK)
        h = jnp.tanh(y[ncp:ncp + att, :]) * jax.nn.sigmoid(
            y[ncp + attp:ncp + attp + att, :])         # (att, TK)
        logits = jnp.dot(w3_ref[...], h,
                         preferred_element_type=jnp.float32) + b3_ref[...]
        xw_ref[0] = jax.nn.sigmoid(logits)             # (1, TK) lane dense
    return kernel


# --------------------------------------------------------------------------
# Kernel 2: pred[b] = w_row[b] @ x_local_view[b]   ((1,K)@(K,NC) matvec)
# --------------------------------------------------------------------------
def _weighted_sum_kernel(xl_ref, xw_ref, pred_ref):
    pred_ref[0] = jnp.dot(xw_ref[0], xl_ref[0],
                          preferred_element_type=jnp.float32)   # (1, NC)


def bagnet_v2_forward(x_nchw, params):
    B, C, H, W = x_nchw.shape
    K = H * W
    NC = params["wc"].shape[1]
    ATT = params["w1"].shape[1]
    NCp = _round_up(NC, 8)
    ATTp = _round_up(ATT, 8)
    F = NCp + 2 * ATTp
    TK = _choose_k_tile(K)
    nk = K // TK

    # ---- parameter prep (fused + pre-transposed; const-folds under jit) ----
    wbig = jnp.zeros((F, C), jnp.float32)
    wbig = wbig.at[:NC].set(params["wc"].T)
    wbig = wbig.at[NCp:NCp + ATT].set(params["w1"].T)
    wbig = wbig.at[NCp + ATTp:NCp + ATTp + ATT].set(params["w2"].T)
    bbig = jnp.zeros((F, 1), jnp.float32)
    bbig = bbig.at[:NC, 0].set(params["bc"][0])
    bbig = bbig.at[NCp:NCp + ATT, 0].set(params["b1"][0])
    bbig = bbig.at[NCp + ATTp:NCp + ATTp + ATT, 0].set(params["b2"][0])
    w3row = params["w3"].T                      # (1, ATT) pre-transposed
    b3 = params["b3"]                           # (1, 1)

    # channel-major tokens: free reshape of the NCHW input (no transpose).
    x_conv = x_nchw.reshape(B, C, K)

    kernel1 = _make_bagnet_kernel(NC, ATT, NCp, ATTp)
    x_local_conv, xw_row = pl.pallas_call(
        kernel1,
        out_shape=(jax.ShapeDtypeStruct((B, NC, K), jnp.float32),
                   jax.ShapeDtypeStruct((B, 1, K), jnp.float32)),
        grid_spec=pltpu.PrefetchScalarGridSpec(
            num_scalar_prefetch=0,
            grid=(B, nk),
            in_specs=[
                pl.BlockSpec((1, C, TK), lambda b, k: (b, 0, k)),   # x_conv
                pl.BlockSpec((F, C), lambda b, k: (0, 0)),          # fused W
                pl.BlockSpec((F, 1), lambda b, k: (0, 0)),          # fused b
                pl.BlockSpec((1, ATT), lambda b, k: (0, 0)),        # att_outer W^T
                pl.BlockSpec((1, 1), lambda b, k: (0, 0)),          # att_outer b
            ],
            out_specs=[
                pl.BlockSpec((1, NC, TK), lambda b, k: (b, 0, k)),
                pl.BlockSpec((1, 1, TK), lambda b, k: (b, 0, k)),
            ],
        ),
        compiler_params=pltpu.CompilerParams(
            dimension_semantics=("parallel", "parallel"),
            vmem_limit_bytes=48 * 1024 * 1024),
    )(x_conv, wbig, bbig, w3row, b3)

    # PyTorch's `x_local.view(b, k, num_classes)` on the NCHW conv output is a
    # raw memory reinterpretation; the kernel already emitted the conv memory
    # layout (B, NC, K), so this reshape is free (no transpose, no copy).
    x_local = x_local_conv.reshape(B, K, NC)
    x_weight = xw_row.reshape(B, K, 1)          # also a free reshape

    pred3 = pl.pallas_call(
        _weighted_sum_kernel,
        out_shape=jax.ShapeDtypeStruct((B, 1, NC), jnp.float32),
        grid_spec=pltpu.PrefetchScalarGridSpec(
            num_scalar_prefetch=0,
            grid=(B,),
            in_specs=[
                pl.BlockSpec((1, K, NC), lambda b: (b, 0, 0)),
                pl.BlockSpec((1, 1, K), lambda b: (b, 0, 0)),
            ],
            out_specs=pl.BlockSpec((1, 1, NC), lambda b: (b, 0, 0)),
        ),
        compiler_params=pltpu.CompilerParams(
            dimension_semantics=("parallel",)),
    )(x_local, xw_row)

    pred = pred3[:, 0, :]
    return pred, x_local, x_weight


# --------------------------------------------------------------------------
# Pure-JAX reference (mirrors the PyTorch forward exactly)
# --------------------------------------------------------------------------
def reference_forward(x_nchw, params):
    B, C, H, W = x_nchw.shape
    K = H * W
    NC = params["wc"].shape[1]
    conv_out = jnp.einsum("bchw,cn->bnhw", x_nchw, params["wc"]) \
        + params["bc"][0][None, :, None, None]                  # (B, NC, H, W)
    x_tok = jnp.transpose(x_nchw, (0, 2, 3, 1)).reshape(B, K, C)
    xt = x_tok.reshape(-1, C)
    h = jnp.tanh(xt @ params["w1"] + params["b1"]) * \
        jax.nn.sigmoid(xt @ params["w2"] + params["b2"])
    w = jax.nn.sigmoid(h @ params["w3"] + params["b3"]).reshape(B, K, 1)
    x_local = conv_out.reshape(B, K, NC)        # the .view() memory scramble
    pred = jnp.sum(x_local * w, axis=1)
    return pred, x_local, w


if __name__ == "__main__":
    # Small, shape-consistent config: num_fmap_channels=32 (stands in for 2048),
    # att_dim=32, num_classes=8, feature map 4x4, batch 2.
    B, C, H, W = 2, 32, 4, 4
    ATT, NC = 32, 8

    key = jax.random.PRNGKey(0)
    ks = jax.random.split(key, 10)
    params = {
        "wc": jax.random.normal(ks[0], (C, NC), jnp.float32) / jnp.sqrt(C),
        "bc": jax.random.normal(ks[1], (1, NC), jnp.float32) * 0.1,
        "w1": jax.random.normal(ks[2], (C, ATT), jnp.float32) / jnp.sqrt(C),
        "b1": jax.random.normal(ks[3], (1, ATT), jnp.float32) * 0.1,
        "w2": jax.random.normal(ks[4], (C, ATT), jnp.float32) / jnp.sqrt(C),
        "b2": jax.random.normal(ks[5], (1, ATT), jnp.float32) * 0.1,
        "w3": jax.random.normal(ks[6], (ATT, 1), jnp.float32) / jnp.sqrt(ATT),
        "b3": jax.random.normal(ks[7], (1, 1), jnp.float32) * 0.1,
    }
    x = jax.random.normal(ks[8], (B, C, H, W), jnp.float32)

    pred, x_local, x_weight = jax.block_until_ready(bagnet_v2_forward(x, params))
    pred_r, x_local_r, x_weight_r = reference_forward(x, params)

    assert pred.shape == (B, NC)
    assert x_local.shape == (B, H * W, NC)
    assert x_weight.shape == (B, H * W, 1)
    assert jnp.allclose(pred, pred_r, atol=1e-5, rtol=1e-5)
    assert jnp.allclose(x_local, x_local_r, atol=1e-5, rtol=1e-5)
    assert jnp.allclose(x_weight, x_weight_r, atol=1e-5, rtol=1e-5)

    print("KERNEL_OK")
</pallas_src>

<mosaic_0001>
module attributes {stable_mosaic.version = 11 : i64} {
  func.func @kernel(%arg0: i32, %arg1: i32, %arg2: memref<1x32x16xf32, #tpu.memory_space<vmem>>, %arg3: memref<72x32xf32, #tpu.memory_space<vmem>>, %arg4: memref<72x1xf32, #tpu.memory_space<vmem>>, %arg5: memref<1x32xf32, #tpu.memory_space<vmem>>, %arg6: memref<1x1xf32, #tpu.memory_space<vmem>>, %arg7: memref<1x8x16xf32, #tpu.memory_space<vmem>>, %arg8: memref<1x1x16xf32, #tpu.memory_space<vmem>>) attributes {dimension_semantics = [#tpu.dimension_semantics<parallel>, #tpu.dimension_semantics<parallel>], iteration_bounds = array<i64: 2, 1>, scalar_prefetch = 0 : i64, scratch_operands = 0 : i64, tpu.core_type = #tpu.core_type<tc>, window_params = [{transform_indices = @transform_0, window_bounds = array<i64: 1, 32, 16>}, {pipeline_mode = #tpu.pipeline_mode<synchronous>, transform_indices = @transform_1, window_bounds = array<i64: 72, 32>}, {pipeline_mode = #tpu.pipeline_mode<synchronous>, transform_indices = @transform_2, window_bounds = array<i64: 72, 1>}, {pipeline_mode = #tpu.pipeline_mode<synchronous>, transform_indices = @transform_3, window_bounds = array<i64: 1, 32>}, {pipeline_mode = #tpu.pipeline_mode<synchronous>, transform_indices = @transform_4, window_bounds = array<i64: 1, 1>}, {transform_indices = @transform_5, window_bounds = array<i64: 1, 8, 16>}, {transform_indices = @transform_6, window_bounds = array<i64: 1, 1, 16>}]} {
    %c0 = arith.constant 0 : index
    %c0_0 = arith.constant 0 : index
    %c0_1 = arith.constant 0 : index
    %0 = vector.load %arg2[%c0, %c0_0, %c0_1] : memref<1x32x16xf32, #tpu.memory_space<vmem>>, vector<1x32x16xf32>
    %1 = vector.shape_cast %0 : vector<1x32x16xf32> to vector<32x16xf32>
    %c0_2 = arith.constant 0 : index
    %c0_3 = arith.constant 0 : index
    %2 = vector.load %arg3[%c0_2, %c0_3] : memref<72x32xf32, #tpu.memory_space<vmem>>, vector<72x32xf32>
    %cst = arith.constant dense<0.000000e+00> : vector<72x16xf32>
    %3 = tpu.matmul %2, %1, %cst {dimension_numbers = #tpu.dot_dimension_numbers<[1], [0], [0], [1], [0, 0, 1, 1], [], []>} : vector<72x32xf32>, vector<32x16xf32>, vector<72x16xf32> -> vector<72x16xf32>
    %c0_4 = arith.constant 0 : index
    %c0_5 = arith.constant 0 : index
    %4 = vector.load %arg4[%c0_4, %c0_5] : memref<72x1xf32, #tpu.memory_space<vmem>>, vector<72x1xf32>
    %5 = vector.broadcast %4 : vector<72x1xf32> to vector<72x16xf32>
    %6 = arith.addf %3, %5 : vector<72x16xf32>
    %7 = vector.extract_strided_slice %6 {offsets = [0, 0], sizes = [8, 16], strides = [1, 1]} : vector<72x16xf32> to vector<8x16xf32>
    %c0_6 = arith.constant 0 : index
    %c0_7 = arith.constant 0 : index
    %c0_8 = arith.constant 0 : index
    %8 = vector.load %arg7[%c0_6, %c0_7, %c0_8] : memref<1x8x16xf32, #tpu.memory_space<vmem>>, vector<1x8x16xf32>
    %9 = vector.shape_cast %8 : vector<1x8x16xf32> to vector<8x16xf32>
    %10 = vector.shape_cast %7 : vector<8x16xf32> to vector<1x8x16xf32>
    tpu.vector_store %arg7[%c0_6, %c0_7, %c0_8], %10 {strides = array<i32>} : memref<1x8x16xf32, #tpu.memory_space<vmem>>, vector<1x8x16xf32>,
    %11 = vector.extract_strided_slice %6 {offsets = [8, 0], sizes = [32, 16], strides = [1, 1]} : vector<72x16xf32> to vector<32x16xf32>
    %12 = math.tanh %11 : vector<32x16xf32>
    %13 = vector.extract_strided_slice %6 {offsets = [40, 0], sizes = [32, 16], strides = [1, 1]} : vector<72x16xf32> to vector<32x16xf32>
    %14 = arith.negf %13 : vector<32x16xf32>
    %15 = math.exp %14 : vector<32x16xf32>
    %cst_9 = arith.constant 1.000000e+00 : f32
    %16 = vector.broadcast %cst_9 : f32 to vector<32x16xf32>
    %17 = arith.addf %16, %15 : vector<32x16xf32>
    %18 = arith.divf %16, %17 : vector<32x16xf32>
    %19 = arith.mulf %12, %18 : vector<32x16xf32>
    %c0_10 = arith.constant 0 : index
    %c0_11 = arith.constant 0 : index
    %20 = vector.load %arg5[%c0_10, %c0_11] : memref<1x32xf32, #tpu.memory_space<vmem>>, vector<1x32xf32>
    %cst_12 = arith.constant dense<0.000000e+00> : vector<1x16xf32>
    %21 = tpu.matmul %20, %19, %cst_12 {dimension_numbers = #tpu.dot_dimension_numbers<[1], [0], [0], [1], [0, 0, 1, 1], [], []>} : vector<1x32xf32>, vector<32x16xf32>, vector<1x16xf32> -> vector<1x16xf32>
    %c0_13 = arith.constant 0 : index
    %c0_14 = arith.constant 0 : index
    %22 = vector.load %arg6[%c0_13, %c0_14] : memref<1x1xf32, #tpu.memory_space<vmem>>, vector<1x1xf32>
    %23 = vector.broadcast %22 : vector<1x1xf32> to vector<1x16xf32>
    %24 = arith.addf %21, %23 : vector<1x16xf32>
    %25 = arith.negf %24 : vector<1x16xf32>
    %26 = math.exp %25 : vector<1x16xf32>
    %cst_15 = arith.constant 1.000000e+00 : f32
    %27 = vector.broadcast %cst_15 : f32 to vector<1x16xf32>
    %28 = arith.addf %27, %26 : vector<1x16xf32>
    %29 = arith.divf %27, %28 : vector<1x16xf32>
    %c0_16 = arith.constant 0 : index
    %c0_17 = arith.constant 0 : index
    %c0_18 = arith.constant 0 : index
    %30 = vector.load %arg8[%c0_16, %c0_17, %c0_18] : memref<1x1x16xf32, #tpu.memory_space<vmem>>, vector<1x1x16xf32>
    %31 = vector.shape_cast %30 : vector<1x1x16xf32> to vector<1x16xf32>
    %32 = vector.shape_cast %29 : vector<1x16xf32> to vector<1x1x16xf32>
    tpu.vector_store %arg8[%c0_16, %c0_17, %c0_18], %32 {strides = array<i32>} : memref<1x1x16xf32, #tpu.memory_space<vmem>>, vector<1x1x16xf32>,
    return
  }
  func.func @transform_0(%arg0: i32, %arg1: i32) -> (i32, i32, i32) {
    %c0_i32 = arith.constant 0 : i32
    %c0_i32_0 = arith.constant 0 : i32
    return %arg0, %c0_i32, %arg1 : i32, i32, i32
  }
  func.func @transform_1(%arg0: i32, %arg1: i32) -> (i32, i32) {
    %c0_i32 = arith.constant 0 : i32
    %c0_i32_0 = arith.constant 0 : i32
    %c0_i32_1 = arith.constant 0 : i32
    return %c0_i32, %c0_i32_0 : i32, i32
  }
  func.func @transform_2(%arg0: i32, %arg1: i32) -> (i32, i32) {
    %c0_i32 = arith.constant 0 : i32
    %c0_i32_0 = arith.constant 0 : i32
    %c0_i32_1 = arith.constant 0 : i32
    return %c0_i32, %c0_i32_0 : i32, i32
  }
  func.func @transform_3(%arg0: i32, %arg1: i32) -> (i32, i32) {
    %c0_i32 = arith.constant 0 : i32
    %c0_i32_0 = arith.constant 0 : i32
    %c0_i32_1 = arith.constant 0 : i32
    return %c0_i32, %c0_i32_0 : i32, i32
  }
  func.func @transform_4(%arg0: i32, %arg1: i32) -> (i32, i32) {
    %c0_i32 = arith.constant 0 : i32
    %c0_i32_0 = arith.constant 0 : i32
    %c0_i32_1 = arith.constant 0 : i32
    return %c0_i32, %c0_i32_0 : i32, i32
  }
  func.func @transform_5(%arg0: i32, %arg1: i32) -> (i32, i32, i32) {
    %c0_i32 = arith.constant 0 : i32
    %c0_i32_0 = arith.constant 0 : i32
    return %arg0, %c0_i32, %arg1 : i32, i32, i32
  }
  func.func @transform_6(%arg0: i32, %arg1: i32) -> (i32, i32, i32) {
    %c0_i32 = arith.constant 0 : i32
    %c0_i32_0 = arith.constant 0 : i32
    return %arg0, %c0_i32, %arg1 : i32, i32, i32
  }
}

</mosaic_0001>

<bundles_post_ra>
// kernel: tpu_custom_call.1
= control target key start
LH: loop header
LB: loop body
LE: loop exit
PB: predicated region body
PF: predicated region fallthrough
CT: control target
= control target key end

     0   :  { %s1353_s0 = inlined_call_operand.vmem [shape: f32[2,32,16], index: 0, kind: input, shape index: {}]   ;;  %s1354_s1 = inlined_call_operand.vmem [shape: f32[72,32], index: 1, kind: input, shape index: {}]   ;;  %s1355_s2 = inlined_call_operand.vmem [shape: f32[72,1], index: 2, kind: input, shape index: {}]   ;;  %s1356_s3 = inlined_call_operand.vmem [shape: f32[1,32], index: 3, kind: input, shape index: {}]   ;;  %s1357_s4 = inlined_call_operand.<no memory space> [shape: f32[1,1], index: 4, kind: input, shape index: {}]   ;;  %s1358_s5 = inlined_call_operand.hbm [shape: f32[2,8,16], index: 5, kind: output, shape index: {0}]   ;;  %s1359_s6 = inlined_call_operand.hbm [shape: f32[2,1,16], index: 6, kind: output, shape index: {1}]  }
   0x1   :  { %v12_v0 = vstv %s1357_s4 }
   0x2   :  { %13 = vst [vmem:[#allocation2] sm:$0x1] %v12_v0 }
   0x3   :  { %14 = vsyncpa [#allocation4], 0 }
   0x4   :  { %16 = vsyncpa [#allocation4 + $0x1], 0 }
   0x5   :  { %17 = vsyncpa [#allocation6], 0 }
   0x6   :  { %19 = vsyncpa [#allocation6 + $0x1], 0  ;;  %s1115_s23 = smov 0   ;;  %s1117_s24 = smov 0  }
   0x7   :  { %s1119_s25 = smov 0   ;;  %s1121_s26 = smov 0  }
   0x8   :  { %s1123_s27 = smov 0   ;;  %s1125_s28 = smov 0  }
   0x9 LB: > { %s756_s4 = sadd.s32 4294967295, %s1069_s28   ;;  %s757_s29 = sadd.s32 4294967294, %s1069_s28   ;;  %s1069_s28 = sphi %s1125_s28, %s25_s28   ;;  %s1065_s27 = sphi %s1123_s27, %s1366_s27   ;;  %s1061_s26 = sphi %s1121_s26, %s1365_s26   ;;  %s1057_s25 = sphi %s1119_s25, %s1364_s25   ;;  %s1053_s24 = sphi %s1117_s24, %s1363_s24   ;;  %s1049_s23 = sphi %s1115_s23, %s1362_s23  }
   0xa   : > { %s37_s30 = sadd.s32 1, %s1065_s27  ;;  %s158_s7 = sadd.s32 1, %s1057_s25 }
   0xb   : > { %p39_p0 = scmp.ge.s32.totalorder %s37_s30, 2  ;;  %p168_p1 = scmp.ne.s32.totalorder %s1057_s25, %s1053_s24 }
   0xc   : > { %p169_p2 = scmp.eq.s32.totalorder %s756_s4, 1  ;;  %p174_p3 = scmp.ne.s32.totalorder %s1053_s24, %s1049_s23 }
   0xd   : > { %s1368_s30 = smov (%p39_p0, %s37_s30), 0  ;;  %p175_p5 = scmp.eq.s32.totalorder %s757_s29, 1 }
   0xe   : > { %p1155_p4 = por %p169_p2, %p168_p1  ;;  %s153_s9 = ssub.s32 %s1065_s27, %s1368_s30 }
   0xf   : > { %p760_p6 = scmp.ge.s32.totalorder %s1069_s28, 1  ;;  %p156_p7 = scmp.eq.s32.totalorder %s153_s9, 0 }
  0x10   : > { %p1162_p8 = por %p175_p5, %p174_p3  ;;  %p244_p9 = scmp.lt.s32.totalorder %s1069_s28, 3 }
  0x11   : > { %s1168_s11 = scalar_select %p156_p7, %s1057_s25, %s158_s7  }
  0x12   : > { %p245_p10 = pnand %p760_p6, %p244_p9 }
  0x13   : > { %p281_p11 = scmp.lt.s32.totalorder (!%p245_p10), %s1061_s26, 1  ;;  %v1071_v1 = vmov (!%p245_p10), 0.0|0.0   ;;  %vm1072_vm0 = vmmov (!%p245_p10), 0   ;;  %v1073_v2 = vmov (!%p245_p10), 0.0   ;;  %v1074_v3 = vmov (!%p245_p10), 0   ;;  %v307_v4 = vld [vmem:[%s1355_s2 + $0x28] sm:$0xff] (!%p245_p10) }
  0x14   : > { %248 = sbr.rel (%p245_p10) target bundleno = 554 (0x22a), region = 40  ;;  %849 = vmatprep.subr.bf16.mxu0 (!%p245_p10), %v1071_v1  ;;  %861 = vmatprep.subr.bf16.mxu1 (!%p245_p10), %v1071_v1  ;;  %v309_v5 = vld [vmem:[%s1355_s2 + $0x38] sm:$0xff] (!%p245_p10)  ;;  %v308_v6 = vld [vmem:[%s1355_s2 + $0x30] sm:$0xff] (!%p245_p10)  ;;  %v310_v12 = vld [vmem:[%s1355_s2 + $0x40] sm:$0xff] (!%p245_p10)  ;;  %vm356_vm1 = vcmask (!%p245_p10), 261120   ;;  %s1264_s4 = sand.u32 (!%p245_p10), 1, %s1053_s24  }
  0x15   : > { %811 = vmatprep.mubr.msk.f32.mxu0 (!%p245_p10), %vm1072_vm0, %v1073_v2  ;;  %826 = vmatprep.mubr.msk.f32.mxu1 (!%p245_p10), %vm1072_vm0, %v1073_v2  ;;  %v303_v14 = vld [vmem:[%s1355_s2 + $0x8] sm:$0xff] (!%p245_p10)  ;;  %v304_v15 = vld [vmem:[%s1355_s2 + $0x10] sm:$0xff] (!%p245_p10)  ;;  %v293_v16 = vld [vmem:[%s1354_s1] sm:$0xff] (!%p245_p10)  ;;  %s761_s29 = sshll.u32 (!%p245_p10), %s1264_s4, 3  ;;  %vm494_vm2 = vcmask (!%p245_p10), 130048   ;;  %s780_s13 = sshll.u32 (!%p245_p10), %s1061_s26, 7 }
  0x16   : > { %929 = vset.pattern.permute.xlu0 (!%p245_p10), %v1074_v3  ;;  %930 = vset.pattern.permute.xlu1 (!%p245_p10), %v1074_v3  ;;  %v298_v17 = vld [vmem:[%s1354_s1 + $0x28] sm:$0xff] (!%p245_p10)  ;;  %v305_v18 = vld [vmem:[%s1355_s2 + $0x18] sm:$0xff] (!%p245_p10)  ;;  %v306_v19 = vld [vmem:[%s1355_s2 + $0x20] sm:$0xff] (!%p245_p10)  ;;  %s1267_s7 = scalar_lea.vmem (!%p245_p10), [#allocation3], %s761_s29  ;;  %s1279_s16 = scalar_lea.hbm (!%p245_p10), %s1358_s5, %s780_s13 }
  0x17   : > { %338 = vperm.xlu0 (!%p245_p10), %929, %v307_v4   ;;  %348 = vperm.xlu1 (!%p245_p10), %930, %v309_v5   ;;  %v294_v20 = vld [vmem:[%s1354_s1 + $0x8] sm:$0xff] (!%p245_p10)  ;;  %v299_v21 = vld [vmem:[%s1354_s1 + $0x30] sm:$0xff] (!%p245_p10)  ;;  %v529_v22 = vld [vmem:[#allocation2] sm:$0x1] (!%p245_p10)  ;;  %s639_s17 = sshll.u32 (!%p245_p10), %s1267_s7, 4  ;;  %s621_s18 = scalar_lea.sflag (!%p245_p10), [#allocation4], %s1264_s4  ;;  %s640_s17 = int_to_ptr.vmem [resolvable:$true] %s639_s17 }
  0x18   : > { %v302_v23 = vld [vmem:[%s1355_s2] sm:$0xff] (!%p245_p10)  ;;  %v295_v24 = vld [vmem:[%s1354_s1 + $0x10] sm:$0xff] (!%p245_p10)  ;;  %v300_v25 = vld [vmem:[%s1354_s1 + $0x38] sm:$0xff] (!%p245_p10)  ;;  %s959_s19 = scalar_lea.vmem (!%p245_p10), %s640_s17, 128 }
  0x19   : > { %v296_v26 = vld [vmem:[%s1354_s1 + $0x18] sm:$0xff] (!%p245_p10)  ;;  %v301_v27 = vld [vmem:[%s1354_s1 + $0x40] sm:$0xff] (!%p245_p10)  ;;  %p960_p12 = scmp.ne.s32.totalorder (!%p245_p10), %s640_s17, %s959_s19 }
  0x1a   : > { %v297_v28 = vld [vmem:[%s1354_s1 + $0x20] sm:$0xff] (!%p245_p10) }
  0x1b   : > { %s282_s12 = scalar_select %p281_p11, %s1061_s26, 1  ;;  %343 = vperm.xlu0 %929, %v308_v6   ;;  %353 = vperm.xlu1 %930, %v310_v12  }
  0x1c   : > { %p961_p13 = pnand %p960_p12, %p1155_p4 }
  0x1d   : > { %s784_s15 = sshll.u32 %s282_s12, 5 }
  0x1e   : > { %s288_s20 = scalar_lea.vmem %s1353_s0, %s784_s15  ;;  %p962_p0 = pneg %p961_p13 }
  0x1f   : > { %v289_v7 = vld [vmem:[%s288_s20] sm:$0xff]  ;;  %v290_v8 = vld [vmem:[%s288_s20 + $0x8] sm:$0xff]  ;;  %v291_v9 = vld [vmem:[%s288_s20 + $0x10] sm:$0xff]  ;;  %318 = vperm.xlu0 %929, %v303_v14   ;;  %323 = vperm.xlu1 %930, %v304_v15  }
  0x20   : > { %v850_v10 = vpack.c.bf16 %v290_v8, %v289_v7  ;;  %v292_v11 = vld [vmem:[%s288_s20 + $0x18] sm:$0xff]  ;;  %s1075_s20 = smov [#allocation3]  }
  0x21   : > { %v853_v13 = vpack.c.bf16 %v292_v11, %v291_v9  ;;  %s963_s21 = sshll.u32 %s1075_s20, 4  ;;  %s964_s21 = int_to_ptr.vmem [resolvable:$false] %s963_s21 }
  0x22   : > { %851 = vmatpush3.bf16.msra.mxu0 %v850_v10  ;;  %863 = vmatpush3.bf16.msra.mxu1 %v850_v10  ;;  %s965_s22 = scalar_lea.vmem %s964_s21, 256  ;;  %p966_p1 = scmp.lt.s32.totalorder %s640_s17, %s964_s21 }
  0x23   : > { %852 = vmatprep.subr.bf16.mxu0 %v1071_v1  ;;  %862 = vmatprep.subr.bf16.mxu1 %v1071_v1  ;;  %p967_p2 = scmp.lt.s32.totalorder %s965_s22, %s959_s19 }
  0x24   : > { %328 = vperm.xlu0 %929, %v305_v18   ;;  %333 = vperm.xlu1 %930, %v306_v19  }
  0x25   : > { %p968_p3 = por %p967_p2, %p966_p1 }
  0x26   : > { %854 = vmatpush3.bf16.msra.mxu0 %v853_v13  ;;  %864 = vmatpush3.bf16.msra.mxu1 %v853_v13 }
  0x27   : > { %855 = vmatprep.subr.bf16.mxu1 %v1071_v1  ;;  %p969_p5 = pnand %p968_p3, %p962_p0 }
  0x28   : > { %532 = vperm.xlu0 %929, %v529_v22   ;;  %313 = vperm.xlu1 %930, %v302_v23  }
  0x29   : > { %812 = vmatmul.mubr.msk.f32.vlgmr.msra.gmra.mrb[0].mxu0 %vm356_vm1, %v293_v16  ;;  %827 = vmatmul.mubr.msk.f32.vlgmr.msra.gmra.mrb[0].mxu1 %vm356_vm1, %v298_v17 }
  0x2a   : > { %814 = vmatprep.mubr.msk.f32.mxu0 %vm1072_vm0, %v1073_v2  ;;  %829 = vmatprep.mubr.msk.f32.mxu1 %vm1072_vm0, %v1073_v2 }
  0x2d   : > { %815 = vmatmul.mubr.msk.f32.gmra.mrb[2].mxu0 %vm356_vm1, %v294_v20  ;;  %830 = vmatmul.mubr.msk.f32.gmra.mrb[2].mxu1 %vm356_vm1, %v299_v21 }
  0x2e   : > { %817 = vmatprep.mubr.msk.f32.mxu0 %vm1072_vm0, %v1073_v2  ;;  %832 = vmatprep.mubr.msk.f32.mxu1 %vm1072_vm0, %v1073_v2 }
  0x31   : > { %818 = vmatmul.mubr.msk.f32.gmra.mrb[4].mxu0 %vm356_vm1, %v295_v24  ;;  %833 = vmatmul.mubr.msk.f32.gmra.mrb[4].mxu1 %vm356_vm1, %v300_v25 }
  0x32   : > { %820 = vmatprep.mubr.msk.f32.mxu0 %vm1072_vm0, %v1073_v2  ;;  %835 = vmatprep.mubr.msk.f32.mxu1 %vm1072_vm0, %v1073_v2 }
  0x35   : > { %821 = vmatmul.mubr.msk.f32.gmra.mrb[6].mxu0 %vm356_vm1, %v296_v26  ;;  %836 = vmatmul.mubr.msk.f32.gmra.mrb[6].mxu1 %vm356_vm1, %v301_v27 }
  0x36   : > { %823 = vmatprep.mubr.msk.f32.mxu0 %vm1072_vm0, %v1073_v2  ;;  %846 = vmatprep.mubr.msk.f32.mxu1 %vm1072_vm0, %v1073_v2 }
  0x39   : > { %824 = vmatmul.mubr.msk.f32.gmra.mrb[8].mxu0 %vm356_vm1, %v297_v28  ;;  %v528_v28 = vld [vmem:[%s1356_s3] sm:$0x1] }
  0x96   : > { %v349_v29 = vpop.permute.xlu1 %348  ;;  %v339_v33 = vpop.permute.xlu0 %338 }
  0x9a   : > { %v354_v30 = vpop.permute.xlu1 %353  ;;  %v344_v41 = vpop.permute.xlu0 %343 }
  0x9e   : > { %v324_v31 = vpop.permute.xlu1 %323  ;;  %v319_v54 = vpop.permute.xlu0 %318 }
  0xa3   : > { %v334_v32 = vpop.permute.xlu1 %333  ;;  %v329_v6 = vpop.permute.xlu0 %328 }
  0xa7   : > { %v314_v34 = vpop.permute.xlu1 %313 }
  0xfc   : > { %v475_v35 = vpop.f32.mrb[0].mxu1  ;;  %v450_v36 = vpop.f32.mrb[0].mxu0 }
  0xfd   : > { %v476_v37 = vadd.f32 %v475_v35, %v339_v33  ;;  %v828_v38 = vpop.f32.mrb[1].mxu1  ;;  %v813_v39 = vpop.f32.mrb[1].mxu0  ;;  %v451_v40 = vadd.f32 %v450_v36, %v314_v34 }
  0xff   : > { %v773_v42 = vmul.f32 -1.442695, %v476_v37  ;;  %495 = vst.msk [vmem:[%s1267_s7] sm:$0xff] %vm494_vm2, %v451_v40 }
 0x100   : > { %v455_v43 = vpop.f32.mrb[2].mxu0  ;;  %v480_v44 = vpop.f32.mrb[2].mxu1 }
 0x101   : > { %931 = vpow2.f32 %v773_v42  ;;  %v481_v45 = vadd.f32 %v480_v44, %v344_v41  ;;  %v831_v46 = vpop.f32.mrb[3].mxu1  ;;  %v816_v47 = vpop.f32.mrb[3].mxu0  ;;  %v456_v56 = vadd.f32 %v455_v43, %v319_v54 }
 0x103   : > { %v774_v48 = vmul.f32 -1.442695, %v481_v45 }
 0x104   : > { %v460_v49 = vpop.f32.mrb[4].mxu0  ;;  %v485_v50 = vpop.f32.mrb[4].mxu1 }
 0x105   : > { %933 = vpow2.f32 %v774_v48  ;;  %v486_v51 = vadd.f32 %v485_v50, %v349_v29  ;;  %v834_v52 = vpop.f32.mrb[5].mxu1  ;;  %v819_v53 = vpop.f32.mrb[5].mxu0  ;;  %v461_v3 = vadd.f32 %v460_v49, %v324_v31 }
 0x107   : > { %v775_v55 = vmul.f32 -1.442695, %v486_v51 }
 0x108   : > { %v465_v57 = vpop.f32.mrb[6].mxu0  ;;  %v490_v58 = vpop.f32.mrb[6].mxu1 }
 0x109   : > { %935 = vpow2.f32 %v775_v55  ;;  %v491_v59 = vadd.f32 %v490_v58, %v354_v30  ;;  %v837_v60 = vpop.f32.mrb[7].mxu1  ;;  %v822_v61 = vpop.f32.mrb[7].mxu0  ;;  %v466_v8 = vadd.f32 %v465_v57, %v329_v6 }
 0x10a   : > { %937 = vtanh.f32 %v456_v56 }
 0x10b   : > { %v932_v62 = vpop.eup %931  ;;  %v776_v63 = vmul.f32 -1.442695, %v491_v59 }
 0x10c   : > { %v512_v0 = vadd.f32 1.0, %v932_v62  ;;  %v470_v2 = vpop.f32.mrb[8].mxu0 }
 0x10d   : > { %939 = vpow2.f32 %v776_v63  ;;  %v825_v4 = vpop.f32.mrb[9].mxu0  ;;  %v471_v11 = vadd.f32 %v470_v2, %v334_v32 }
 0x10e   : > { %941 = vrcp.f32 %v512_v0 }
 0x10f   : > { %v934_v5 = vpop.eup %933  ;;  %943 = vtanh.f32 %v461_v3 }
 0x110   : > { %v513_v7 = vadd.f32 1.0, %v934_v5 }
 0x112   : > { %945 = vrcp.f32 %v513_v7 }
 0x113   : > { %v936_v9 = vpop.eup %935  ;;  %947 = vtanh.f32 %v466_v8 }
 0x114   : > { %v514_v10 = vadd.f32 1.0, %v936_v9  ;;  %v938_v12 = vpop.eup %937 }
 0x116   : > { %949 = vrcp.f32 %v514_v10 }
 0x117   : > { %v940_v13 = vpop.eup %939  ;;  %951 = vtanh.f32 %v471_v11 }
 0x118   : > { %v942_v14 = vpop.eup %941  ;;  %v515_v15 = vadd.f32 1.0, %v940_v13 }
 0x119   : > { %v524_v16 = vmul.f32 %v942_v14, %v938_v12  ;;  %v944_v17 = vpop.eup %943 }
 0x11a   : > { %953 = vrcp.f32 %v515_v15 }
 0x11c   : > { %v946_v18 = vpop.eup %945 }
 0x11d   : > { %v525_v19 = vmul.f32 %v946_v18, %v944_v17  ;;  %v948_v20 = vpop.eup %947 }
 0x11f   : > { %v856_v21 = vpack.c.bf16 %v525_v19, %v524_v16 }
 0x120   : > { %v950_v22 = vpop.eup %949 }
 0x121   : > { %857 = vmatpush3.bf16.msra.mxu1 %v856_v21  ;;  %v526_v23 = vmul.f32 %v950_v22, %v948_v20  ;;  %v952_v24 = vpop.eup %951 }
 0x122   : > { %858 = vmatprep.subr.bf16.mxu1 %v1071_v1 }
 0x124   : > { %v954_v25 = vpop.eup %953 }
 0x125   : > { %v527_v26 = vmul.f32 %v954_v25, %v952_v24 }
 0x127   : > { %v859_v27 = vpack.c.bf16 %v527_v26, %v526_v23 }
 0x129   : > { %860 = vmatpush3.bf16.msra.mxu1 %v859_v27 }
 0x12c   : > { %847 = vmatmul.mubr.msk.f32.vlgmr.msra.gmra.mrb[8].mxu1 %vm356_vm1, %v528_v28 }
 0x12d   : > { %972 = shalt.err (!%p969_p5)
}
 0x12e   : > { %s973_s29 = scalar_lea.hbm %s1279_s16, 128  ;;  %s977_s12 = scalar_lea.hbm %s1358_s5, 256 }
 0x12f   : > { %p974_p6 = scmp.ne.s32.totalorder %s1279_s16, %s973_s29  ;;  %p978_p10 = scmp.lt.u32.totalorder %s1279_s16, %s1358_s5 }
 0x130   : > { %p979_p11 = scmp.lt.u32.totalorder %s977_s12, %s973_s29  ;;  %p981_p13 = scmp.lt.u32.totalorder %s973_s29, %s1279_s16 }
 0x131   : > { %p975_p7 = pnand %p974_p6, %p1155_p4 }
 0x132   : > { %p980_p12 = por %p979_p11, %p978_p10 }
 0x133   : > { %p976_p9 = pneg %p975_p7 }
 0x134   : > { %p982_p0 = por %p981_p13, %p980_p12 }
 0x136   : > { %p983_p1 = pnand %p982_p0, %p976_p9 }
 0x138   : > { %986 = shalt.err (!%p983_p1)
}
 0x139   : > { %865 = dma.vmem_to_hbm [thread:$0]  (%p1155_p4), %s640_s17, 128, %s1279_s16, %s621_s18   ;;  %v535_v1 = vlaneseq  ;;  %v533_v31 = vpop.permute.xlu0 %532  ;;  %vm618_vm3 = vcmask 122880  }
 0x13a   : > { %s781_s15 = sshll.u32 %s1061_s26, 4  ;;  %s280_s19 = scalar_lea.vmem [#allocation5], %s1264_s4 }
 0x13b   : > { %v536_v29 = vshrl.u32 %v535_v1, 7  ;;  %s653_s20 = sshll.u32 %s280_s19, 4  ;;  %s1305_s18 = scalar_lea.hbm %s1359_s6, %s781_s15  ;;  %s1307_s20 = int_to_ptr.vmem [resolvable:$true] %s653_s20 }
 0x13c   : > { %s626_s21 = scalar_lea.sflag [#allocation6], %s1264_s4  ;;  %s987_s22 = scalar_lea.vmem %s1307_s20, 16 }
 0x13d   : > { %v537_v30 = vsub.s32 0, %v536_v29  ;;  %p988_p2 = scmp.ne.s32.totalorder %s1307_s20, %s987_s22  ;;  %s1076_s26 = smov [#allocation5]  }
 0x13e   : > { %s991_s29 = sshll.u32 %s1076_s26, 4  ;;  %s992_s29 = int_to_ptr.vmem [resolvable:$false] %s991_s29 }
 0x13f   : > { %v538_v32 = vrot.slane %v533_v31, %v537_v30  ;;  %p989_p3 = pnand %p988_p2, %p1155_p4  ;;  %s993_s7 = scalar_lea.vmem %s992_s29, 32 }
 0x140   : > { %p994_p6 = scmp.lt.s32.totalorder %s1307_s20, %s992_s29  ;;  %p995_p7 = scmp.lt.s32.totalorder %s993_s7, %s987_s22 }
 0x141   : > { %p990_p5 = pneg %p989_p3 }
 0x142   : > { %p996_p9 = por %p995_p7, %p994_p6 }
 0x144   : > { %p997_p10 = pnand %p996_p9, %p990_p5 }
 0x1ff   : > { %v608_v33 = vpop.f32.mrb[8].mxu1 }
 0x200   : > { %v609_v34 = vadd.f32 %v608_v33, %v538_v32  ;;  %v848_v35 = vpop.f32.mrb[9].mxu1 }
 0x202   : > { %v778_v36 = vmul.f32 -1.442695, %v609_v34 }
 0x204   : > { %955 = vpow2.f32 %v778_v36 }
 0x20e   : > { %v956_v37 = vpop.eup %955 }
 0x20f   : > { %v615_v38 = vadd.f32 1.0, %v956_v37 }
 0x211   : > { %957 = vrcp.f32 %v615_v38 }
 0x21b   : > { %v958_v39 = vpop.eup %957 }
 0x21c   : > { %619 = vst.msk [vmem:[%s280_s19] sm:$0x1] %vm618_vm3, %v958_v39 }
 0x21d   : > { %1000 = shalt.err (!%p997_p10)
}
 0x21e   : > { %s1001_s4 = scalar_lea.hbm %s1305_s18, 16  ;;  %s1005_s13 = scalar_lea.hbm %s1359_s6, 32 }
 0x21f   : > { %p1002_p11 = scmp.ne.s32.totalorder %s1305_s18, %s1001_s4  ;;  %p1006_p0 = scmp.lt.u32.totalorder %s1305_s18, %s1359_s6 }
 0x220   : > { %p1007_p1 = scmp.lt.u32.totalorder %s1005_s13, %s1001_s4  ;;  %p1009_p3 = scmp.lt.u32.totalorder %s1001_s4, %s1305_s18 }
 0x221   : > { %p1003_p12 = pnand %p1002_p11, %p1155_p4 }
 0x222   : > { %p1008_p2 = por %p1007_p1, %p1006_p0 }
 0x223   : > { %p1004_p13 = pneg %p1003_p12 }
 0x224   : > { %p1010_p5 = por %p1009_p3, %p1008_p2 }
 0x226   : > { %p1011_p6 = pnand %p1010_p5, %p1004_p13 }
 0x228   : > { %1014 = shalt.err (!%p1011_p6)
}
 0x229   : > { %866 = dma.vmem_to_hbm [thread:$0]  (%p1155_p4), %s1307_s20, 16, %s1305_s18, %s626_s21  }
 0x22a PF: > { %p876_p7 = scmp.ge.s32.totalorder %s1069_s28, 2  ;;  %s665_s19 = sand.u32 1, %s1049_s23  }
 0x22b   : > { %s666_s16 = scalar_lea.sflag [#allocation4], %s665_s19 }
 0x22c   : > { %p870_p9 = pnand %p876_p7, %p1162_p8 }
 0x22e   : > { %1040 = dma.done.wait (!%p870_p9), %s666_s16, 128  }
 0x22f   : > { %1042 = vsyncadd (!%p870_p9), %s666_s16, 4294967168  ;;  %s675_s17 = scalar_lea.sflag [#allocation6], %s665_s19 }
 0x230   : > { %1044 = dma.done.wait (!%p870_p9), %s675_s17, 16  }
 0x231   : > { %1046 = vsyncadd (!%p870_p9), %s675_s17, 4294967280  ;;  %s25_s28 = sadd.s32 1, %s1069_s28   ;;  %s1362_s23 = smov %s1053_s24 }
 0x232   : > { %p22_p10 = scmp.ge.s32.totalorder %s25_s28, 4   ;;  %s1363_s24 = smov %s1057_s25 }
 0x233   : > { %s1364_s25 = smov %s1168_s11  ;;  %s1365_s26 = smov %s1065_s27 }
 0x234   : > { %s1366_s27 = smov %s1368_s30  ;;  %24 = sbr.rel (!%p22_p10) target bundleno = 9 (0x9), region = 92 }
 0x23b   :  { %679 = vsyncpa [#allocation4], 1 }
 0x23c   :  { %681 = vsyncpa [#allocation4 + $0x1], 1 }
 0x23d   :  { %682 = vsyncpa [#allocation6], 1 }
 0x23e   :  { %684 = vsyncpa [#allocation6 + $0x1], 1 }

</bundles_post_ra>
